<compile_context>
chip_gen: v5e
topology: v5e:2x2
jax: 0.10.0
libtpu: 0.0.40
codegen_flags: <defaults>
</compile_context>

<pallas_src>
import functools

import jax
import jax.numpy as jnp
import numpy as np
from jax.experimental import pallas as pl
from jax.experimental.pallas import tpu as pltpu


# ---------------------------------------------------------------------------
# Kernels
# ---------------------------------------------------------------------------

def _dense_kernel(x_ref, p_ref, o_ref, *, inv_scale):
    # x_ref: (b, Ht*Wt) lane-dense image slices; p_ref: (Ht*Wt, HWout) 0/1.
    acc = jnp.dot(x_ref[...], p_ref[...], preferred_element_type=jnp.float32)
    o_ref[...] = (acc * inv_scale).astype(o_ref.dtype)


def _sep_mm_kernel(x_ref, pw_ref, o_ref, *, kh, wt, inv_scale):
    # x_ref: (b, kh*Wt) -- each row is kh consecutive image rows concatenated.
    # H-axis (kh) reduction on the VPU, W-axis (kw) reduction as a tiny matmul.
    x = x_ref[...]
    y = x[:, :wt]
    for r in range(1, kh):                      # static unroll, kh in {1, 2}
        y = y + x[:, r * wt:(r + 1) * wt]
    acc = jnp.dot(y, pw_ref[...], preferred_element_type=jnp.float32)
    o_ref[...] = (acc * inv_scale).astype(o_ref.dtype)


def _sep_add_kernel(x_ref, o_ref, *, kh, wt, inv_scale):
    # Pure-VPU path (kw == 1, i.e. 'timepreserve'): no MXU at all, full f32 adds.
    x = x_ref[...].astype(jnp.float32)
    y = x[:, :wt]
    for r in range(1, kh):
        y = y + x[:, r * wt:(r + 1) * wt]
    o_ref[...] = (y * inv_scale).astype(o_ref.dtype)


# ---------------------------------------------------------------------------
# Host-side constant pooling matrices (numpy; 0/1 valued, scale in epilogue)
# ---------------------------------------------------------------------------

def _pool_matrix(ht, wt, kh, kw, dtype):
    """(Ht*Wt, Hout*Wout) 0/1 matrix implementing avg_pool2d((kh,kw)) on trimmed HW."""
    hout, wout = ht // kh, wt // kw
    i = np.arange(ht)
    j = np.arange(wt)
    col = (i[:, None] // kh) * wout + (j[None, :] // kw)         # (ht, wt)
    p = col.reshape(ht * wt, 1) == np.arange(hout * wout)[None, :]
    return jnp.asarray(p.astype(np.float32), dtype=dtype)


def _w_pool_matrix(wt, kw, dtype):
    """(Wt, Wout) 0/1 matrix implementing the W-axis part of the pooling."""
    wout = wt // kw
    p = (np.arange(wt)[:, None] // kw) == np.arange(wout)[None, :]
    return jnp.asarray(p.astype(np.float32), dtype=dtype)


# ---------------------------------------------------------------------------
# Generation-aware block sizing / VMEM budgeting
# ---------------------------------------------------------------------------

def _vmem_capacity_bytes():
    try:
        return int(pltpu.get_tpu_info().vmem_capacity_bytes)
    except Exception:
        return 64 << 20            # assume the smallest generation (v7x) if unknown


def _block_plan(nrows, row_in_bytes, row_out_bytes, p_bytes, target_block_bytes=None):
    """Rows per grid step (multiple of 8 sublanes) + explicit vmem_limit_bytes."""
    cap = _vmem_capacity_bytes()
    # Bigger blocks amortize the ~0.35us/step overhead: 8 MiB on 128-MiB-VMEM
    # parts (v5e/v6e), 4 MiB on v7x (64 MiB VMEM).  Tunable via the argument.
    target = target_block_bytes or ((8 << 20) if cap >= (128 << 20) else (4 << 20))
    # Keep 2*in + 2*out + 2*P comfortably below the scoped-VMEM limit on every
    # generation (v7x default scoped limit is 32 MiB, physical 64 MiB).
    budget = min(cap // 3, 28 << 20)

    if nrows <= 8:
        b = nrows
    else:
        per_row = 2 * row_in_bytes + 2 * row_out_bytes
        b = max(8, (target // max(row_in_bytes, 1)) // 8 * 8)
        fit = (budget - 2 * p_bytes) // max(per_row, 1)
        b = min(b, max(8, (fit // 8) * 8))
        # >= 4 grid steps when the problem is large enough: >= 2 pipelined
        # (prefetch-able) steps per TensorCore under v7x megacore sharding.
        quarter = (nrows // 4) // 8 * 8
        if quarter >= 8:
            b = min(b, quarter)
        else:
            half = (nrows // 2) // 8 * 8
            if half >= 8:
                b = min(b, half)
        b = max(8, min(b, nrows))

    need = 2 * b * row_in_bytes + 2 * b * row_out_bytes + 2 * p_bytes
    # Explicit limit: above v5e's 16 MiB default when needed, capped well below
    # v7x's 64 MiB physical VMEM.
    vmem_limit = int(min(40 << 20, max(16 << 20, need + (4 << 20))))
    return b, vmem_limit


def _launch(kernel, x2, p, out_cols, block_rows, vmem_limit):
    rows, in_cols = x2.shape
    grid = (pl.cdiv(rows, block_rows),)
    in_specs = [pl.BlockSpec((block_rows, in_cols), lambda i: (i, 0))]
    args = [x2]
    if p is not None:
        # Constant pooling matrix: index_map is constant so it is fetched once
        # and stays resident across grid steps.
        in_specs.append(pl.BlockSpec(p.shape, lambda i: (0, 0)))
        args.append(p)
    return pl.pallas_call(
        kernel,
        out_shape=jax.ShapeDtypeStruct((rows, out_cols), x2.dtype),
        grid_spec=pltpu.PrefetchScalarGridSpec(
            num_scalar_prefetch=0,
            grid=grid,
            in_specs=in_specs,
            out_specs=pl.BlockSpec((block_rows, out_cols), lambda i: (i, 0)),
        ),
        compiler_params=pltpu.CompilerParams(
            dimension_semantics=("parallel",),
            vmem_limit_bytes=vmem_limit,
        ),
    )(*args)


# ---------------------------------------------------------------------------
# Public wrapper: DownSample.forward
# ---------------------------------------------------------------------------

_DENSE_P_MAX_BYTES = 2 << 20     # resident pooling matrix cap for the dense path


def downsample(x, layer_type, *, target_block_bytes=None):
    """Pallas implementation of DownSample.forward for NCHW input x."""
    if layer_type == "none":
        return x
    elif layer_type == "timepreserve":
        kh, kw = 2, 1
    elif layer_type == "half":
        kh, kw = 2, 2
    elif layer_type == "timehalf":
        kh, kw = 1, 2
    else:
        raise RuntimeError(
            "Got unexpected donwsampletype %s, expected is [none, timepreserve, half]"
            % layer_type
        )

    N, C, H, W = x.shape
    Hout, Wout = H // kh, W // kw
    Ht, Wt = Hout * kh, Wout * kw
    if (Ht, Wt) != (H, W):
        x = x[:, :, :Ht, :Wt]           # floor semantics: drop trailing rows/cols
    NC = N * C
    HWout = Hout * Wout
    itemsize = x.dtype.itemsize
    inv = 1.0 / float(kh * kw)

    # Dense path only while it stays HBM-bound on every generation (conservative
    # for v5e f32, whose MXU is bf16-only) and P is small; otherwise separable.
    p_dense_bytes = (Ht * Wt) * HWout * itemsize
    dense_hwout_max = 256 if x.dtype == jnp.bfloat16 else 128
    use_dense = p_dense_bytes <= _DENSE_P_MAX_BYTES and (
        HWout <= dense_hwout_max or kh * Wt < 128
    )

    if use_dense:
        x2 = x.reshape(NC, Ht * Wt)                       # lane-dense 2-D slab
        p = _pool_matrix(Ht, Wt, kh, kw, x.dtype)         # 0/1, scale in epilogue
        b, vmem = _block_plan(NC, Ht * Wt * itemsize, HWout * itemsize,
                              p_dense_bytes, target_block_bytes)
        kern = functools.partial(_dense_kernel, inv_scale=inv)
        out2 = _launch(kern, x2, p, HWout, b, vmem)
        return out2.reshape(N, C, Hout, Wout)

    # Separable path: each slab row = kh consecutive image rows concatenated.
    rows = NC * Hout
    x2 = x.reshape(rows, kh * Wt)
    if kw == 1:
        b, vmem = _block_plan(rows, kh * Wt * itemsize, Wout * itemsize, 0,
                              target_block_bytes)
        kern = functools.partial(_sep_add_kernel, kh=kh, wt=Wt, inv_scale=inv)
        out2 = _launch(kern, x2, None, Wout, b, vmem)
    else:
        pw = _w_pool_matrix(Wt, kw, x.dtype)              # (Wt, Wout), tiny
        b, vmem = _block_plan(rows, kh * Wt * itemsize, Wout * itemsize,
                              Wt * Wout * itemsize, target_block_bytes)
        kern = functools.partial(_sep_mm_kernel, kh=kh, wt=Wt, inv_scale=inv)
        out2 = _launch(kern, x2, pw, Wout, b, vmem)
    return out2.reshape(N, C, Hout, Wout)


# ---------------------------------------------------------------------------
# Reference + self-test
# ---------------------------------------------------------------------------

def _reference(x, layer_type):
    """Plain-JAX reference matching F.avg_pool2d semantics (f32 accumulation)."""
    if layer_type == "none":
        return x
    kh, kw = {"timepreserve": (2, 1), "half": (2, 2), "timehalf": (1, 2)}[layer_type]
    N, C, H, W = x.shape
    Hout, Wout = H // kh, W // kw
    xt = x[:, :, :Hout * kh, :Wout * kw].astype(jnp.float32)
    return xt.reshape(N, C, Hout, kh, Wout, kw).mean(axis=(3, 5))


if __name__ == "__main__":
    key = jax.random.PRNGKey(0)
    cases = [
        ((2, 4, 16, 16), jnp.float32),    # small, even map -> dense-P path
        ((2, 3, 17, 15), jnp.float32),    # odd H/W -> floor/trim semantics
        ((2, 4, 16, 16), jnp.bfloat16),   # low-precision inputs
        ((1, 2, 64, 64), jnp.float32),    # larger map -> separable path
    ]
    ok = True
    for shape, dtype in cases:
        key, sub = jax.random.split(key)
        x = jax.random.normal(sub, shape, dtype=jnp.float32).astype(dtype)
        tol = 1e-5 if dtype == jnp.float32 else 2e-2
        for layer_type in ["none", "timepreserve", "half", "timehalf"]:
            out = jax.block_until_ready(downsample(x, layer_type))
            ref = _reference(x, layer_type)
            if out.shape != ref.shape:
                ok = False
                print(f"shape mismatch {shape} {dtype} {layer_type}: "
                      f"{out.shape} vs {ref.shape}")
            elif not jnp.allclose(out.astype(jnp.float32), ref.astype(jnp.float32),
                                  atol=tol, rtol=tol):
                ok = False
                err = jnp.max(jnp.abs(out.astype(jnp.float32) - ref.astype(jnp.float32)))
                print(f"value mismatch {shape} {dtype} {layer_type}: max err {err}")
    if ok:
        print("KERNEL_OK")
</pallas_src>

<mosaic_0001>
module attributes {stable_mosaic.version = 11 : i64} {
  func.func @_dense_kernel(%arg0: i32, %arg1: memref<8x256xf32, #tpu.memory_space<vmem>>, %arg2: memref<256x128xf32, #tpu.memory_space<vmem>>, %arg3: memref<8x128xf32, #tpu.memory_space<vmem>>) attributes {dimension_semantics = [#tpu.dimension_semantics<parallel>], iteration_bounds = array<i64: 1>, scalar_prefetch = 0 : i64, scratch_operands = 0 : i64, tpu.core_type = #tpu.core_type<tc>, window_params = [{transform_indices = @transform_0, window_bounds = array<i64: 8, 256>}, {pipeline_mode = #tpu.pipeline_mode<synchronous>, transform_indices = @transform_1, window_bounds = array<i64: 256, 128>}, {transform_indices = @transform_2, window_bounds = array<i64: 8, 128>}]} {
    %c0 = arith.constant 0 : index
    %c0_0 = arith.constant 0 : index
    %0 = vector.load %arg1[%c0, %c0_0] : memref<8x256xf32, #tpu.memory_space<vmem>>, vector<8x256xf32>
    %c0_1 = arith.constant 0 : index
    %c0_2 = arith.constant 0 : index
    %1 = vector.load %arg2[%c0_1, %c0_2] : memref<256x128xf32, #tpu.memory_space<vmem>>, vector<256x128xf32>
    %cst = arith.constant dense<0.000000e+00> : vector<8x128xf32>
    %2 = tpu.matmul %0, %1, %cst {dimension_numbers = #tpu.dot_dimension_numbers<[1], [0], [0], [1], [0, 0, 1, 1], [], []>} : vector<8x256xf32>, vector<256x128xf32>, vector<8x128xf32> -> vector<8x128xf32>
    %cst_3 = arith.constant 5.000000e-01 : f32
    %3 = vector.broadcast %cst_3 : f32 to vector<8x128xf32>
    %4 = arith.mulf %2, %3 : vector<8x128xf32>
    %c0_4 = arith.constant 0 : index
    %c0_5 = arith.constant 0 : index
    %5 = vector.load %arg3[%c0_4, %c0_5] : memref<8x128xf32, #tpu.memory_space<vmem>>, vector<8x128xf32>
    tpu.vector_store %arg3[%c0_4, %c0_5], %4 {strides = array<i32>} : memref<8x128xf32, #tpu.memory_space<vmem>>, vector<8x128xf32>,
    return
  }
  func.func @transform_0(%arg0: i32) -> (i32, i32) {
    %c0_i32 = arith.constant 0 : i32
    %c0_i32_0 = arith.constant 0 : i32
    return %arg0, %c0_i32 : i32, i32
  }
  func.func @transform_1(%arg0: i32) -> (i32, i32) {
    %c0_i32 = arith.constant 0 : i32
    %c0_i32_0 = arith.constant 0 : i32
    %c0_i32_1 = arith.constant 0 : i32
    return %c0_i32, %c0_i32_0 : i32, i32
  }
  func.func @transform_2(%arg0: i32) -> (i32, i32) {
    %c0_i32 = arith.constant 0 : i32
    %c0_i32_0 = arith.constant 0 : i32
    return %arg0, %c0_i32 : i32, i32
  }
}

</mosaic_0001>

<bundles_post_ra>
// kernel: tpu_custom_call.1
= control target key start
LH: loop header
LB: loop body
LE: loop exit
PB: predicated region body
PF: predicated region fallthrough
CT: control target
= control target key end

     0   :  { %7 = vsyncpa [#allocation3], 0  ;;  %s248_s0 = inlined_call_operand.hbm [shape: f32[8,256], index: 0, kind: input, shape index: {}]   ;;  %s249_s1 = inlined_call_operand.hbm [shape: f32[256,128], index: 1, kind: input, shape index: {}]   ;;  %s250_s2 = inlined_call_operand.hbm [shape: f32[8,128], index: 2, kind: output, shape index: {}]  }
   0x1   :  { %8 = vsyncpa [#allocation6], 0 }
   0x2   :  { %9 = vsyncpa [#allocation4], 0  ;;  %s15_s11 = sshll.u32 %s248_s0, 4  ;;  %s219_s12 = smov [#allocation2]   ;;  %s16_s11 = int_to_ptr.hbm [resolvable:$true] %s15_s11 }
   0x3   :  { %s17_s13 = sshll.u32 %s219_s12, 4  ;;  %s25_s16 = sshll.u32 %s249_s1, 4  ;;  %s18_s13 = int_to_ptr.vmem [resolvable:$true] %s17_s13  ;;  %s26_s16 = int_to_ptr.hbm [resolvable:$true] %s25_s16 }
   0x4   :  { %20 = dma.hbm_to_vmem [thread:$0]  %s16_s11, 256, %s18_s13, [#allocation3]  }
   0x5   :  { %s220_s17 = smov [#allocation5]   ;;  %s221_s19 = smov 128  }
   0x6   :  { %s27_s18 = sshll.u32 %s220_s17, 4  ;;  %s222_s20 = smov 8   ;;  %s28_s18 = int_to_ptr.vmem [resolvable:$true] %s27_s18 }
   0x7   :  { %33 = dma.hbm_to_vmem [thread:$0]  %s26_s16, 4096, %s28_s18, [#allocation6], %s221_s19, %s221_s19, %s222_s20  }
   0x8   :  { %213 = dma.done.wait [#allocation3], 256  }
   0x9   :  { %214 = vsyncadd [#allocation3], 4294967040 }
   0xa   :  { %215 = dma.done.wait [#allocation6], 4096  }
   0xb   :  { %216 = vsyncadd [#allocation6], 4294963200  ;;  %v59_v0 = vld [vmem:[#allocation5 + $0x78] sm:$0xff]  ;;  %v58_v2 = vld [vmem:[#allocation5 + $0x70] sm:$0xff]  ;;  %s223_s0 = smov [#allocation7]   ;;  %s125_s23 = sshll.u32 %s250_s2, 4  ;;  %s126_s23 = int_to_ptr.hbm [resolvable:$true] %s125_s23 }
   0xc   :  { %v75_v1 = vld [vmem:[#allocation5 + $0xf8] sm:$0xff]  ;;  %76 = vmatpush.msra.mxu0 %v59_v0  ;;  %v74_v3 = vld [vmem:[#allocation5 + $0xf0] sm:$0xff]  ;;  %v57_v4 = vld [vmem:[#allocation5 + $0x68] sm:$0xff]  ;;  %s123_s1 = sshll.u32 %s223_s0, 4  ;;  %s124_s1 = int_to_ptr.vmem [resolvable:$true] %s123_s1 }
   0xd   :  { %96 = vmatpush.msra.mxu1 %v75_v1  ;;  %v73_v5 = vld [vmem:[#allocation5 + $0xe8] sm:$0xff]  ;;  %v56_v6 = vld [vmem:[#allocation5 + $0x60] sm:$0xff]  ;;  %v55_v8 = vld [vmem:[#allocation5 + $0x58] sm:$0xff] }
   0xe   :  { %77 = vmatpush.msra.mxu0 %v58_v2  ;;  %v72_v7 = vld [vmem:[#allocation5 + $0xe0] sm:$0xff]  ;;  %v71_v9 = vld [vmem:[#allocation5 + $0xd8] sm:$0xff]  ;;  %v54_v10 = vld [vmem:[#allocation5 + $0x50] sm:$0xff] }
   0xf   :  { %97 = vmatpush.msra.mxu1 %v74_v3  ;;  %v70_v11 = vld [vmem:[#allocation5 + $0xd0] sm:$0xff]  ;;  %v53_v12 = vld [vmem:[#allocation5 + $0x48] sm:$0xff]  ;;  %v52_v14 = vld [vmem:[#allocation5 + $0x40] sm:$0xff] }
  0x10   :  { %78 = vmatpush.msra.mxu0 %v57_v4  ;;  %v69_v13 = vld [vmem:[#allocation5 + $0xc8] sm:$0xff]  ;;  %v68_v15 = vld [vmem:[#allocation5 + $0xc0] sm:$0xff]  ;;  %v51_v16 = vld [vmem:[#allocation5 + $0x38] sm:$0xff] }
  0x11   :  { %98 = vmatpush.msra.mxu1 %v73_v5  ;;  %v67_v17 = vld [vmem:[#allocation5 + $0xb8] sm:$0xff]  ;;  %v50_v18 = vld [vmem:[#allocation5 + $0x30] sm:$0xff]  ;;  %v49_v20 = vld [vmem:[#allocation5 + $0x28] sm:$0xff] }
  0x12   :  { %79 = vmatpush.msra.mxu0 %v56_v6  ;;  %v66_v19 = vld [vmem:[#allocation5 + $0xb0] sm:$0xff]  ;;  %v65_v21 = vld [vmem:[#allocation5 + $0xa8] sm:$0xff]  ;;  %v48_v22 = vld [vmem:[#allocation5 + $0x20] sm:$0xff] }
  0x13   :  { %99 = vmatpush.msra.mxu1 %v72_v7  ;;  %v64_v23 = vld [vmem:[#allocation5 + $0xa0] sm:$0xff]  ;;  %v47_v24 = vld [vmem:[#allocation5 + $0x18] sm:$0xff]  ;;  %v46_v26 = vld [vmem:[#allocation5 + $0x10] sm:$0xff] }
  0x14   :  { %80 = vmatpush.msra.mxu0 %v55_v8  ;;  %v63_v25 = vld [vmem:[#allocation5 + $0x98] sm:$0xff]  ;;  %v62_v27 = vld [vmem:[#allocation5 + $0x90] sm:$0xff]  ;;  %v45_v28 = vld [vmem:[#allocation5 + $0x8] sm:$0xff] }
  0x15   :  { %100 = vmatpush.msra.mxu1 %v71_v9  ;;  %v61_v29 = vld [vmem:[#allocation5 + $0x88] sm:$0xff]  ;;  %v44_v30 = vld [vmem:[#allocation5] sm:$0xff]  ;;  %v42_v32 = vld [vmem:[#allocation2] sm:$0xff] }
  0x16   :  { %81 = vmatpush.msra.mxu0 %v54_v10  ;;  %v60_v31 = vld [vmem:[#allocation5 + $0x80] sm:$0xff]  ;;  %v43_v33 = vld [vmem:[#allocation2 + $0x8] sm:$0xff] }
  0x17   :  { %101 = vmatpush.msra.mxu1 %v70_v11 }
  0x18   :  { %82 = vmatpush.msra.mxu0 %v53_v12 }
  0x19   :  { %102 = vmatpush.msra.mxu1 %v69_v13 }
  0x1a   :  { %83 = vmatpush.msra.mxu0 %v52_v14 }
  0x1b   :  { %103 = vmatpush.msra.mxu1 %v68_v15 }
  0x1c   :  { %84 = vmatpush.msra.mxu0 %v51_v16 }
  0x1d   :  { %104 = vmatpush.msra.mxu1 %v67_v17 }
  0x1e   :  { %85 = vmatpush.msra.mxu0 %v50_v18 }
  0x1f   :  { %105 = vmatpush.msra.mxu1 %v66_v19 }
  0x20   :  { %86 = vmatpush.msra.mxu0 %v49_v20 }
  0x21   :  { %106 = vmatpush.msra.mxu1 %v65_v21 }
  0x22   :  { %87 = vmatpush.msra.mxu0 %v48_v22 }
  0x23   :  { %107 = vmatpush.msra.mxu1 %v64_v23 }
  0x24   :  { %88 = vmatpush.msra.mxu0 %v47_v24 }
  0x25   :  { %108 = vmatpush.msra.mxu1 %v63_v25 }
  0x26   :  { %89 = vmatpush.msra.mxu0 %v46_v26 }
  0x27   :  { %109 = vmatpush.msra.mxu1 %v62_v27 }
  0x28   :  { %90 = vmatpush.msra.mxu0 %v45_v28 }
  0x29   :  { %110 = vmatpush.msra.mxu1 %v61_v29 }
  0x2a   :  { %91 = vmatpush.msra.mxu0 %v44_v30 }
  0x2b   :  { %111 = vmatpush.msra.mxu1 %v60_v31  ;;  %92 = vmatmul.f32.vlgmr.msra.gmra.mxu0 %v42_v32 }
  0x2c   :  { %112 = vmatmul.f32.vlgmr.msra.gmra.mxu1 %v43_v33 }
  0xa8   :  { %v93_v34 = vpop.f32.mrf.mxu0 }
  0xa9   :  { %v113_v35 = vpop.f32.mrf.mxu1 }
  0xaa   :  { %v114_v36 = vadd.f32 %v113_v35, %v93_v34 }
  0xac   :  { %v116_v37 = vmul.f32 0.5, %v114_v36 }
  0xae   :  { %117 = vst [vmem:[#allocation7] sm:$0xff] %v116_v37 }
  0xaf   :  { %128 = dma.vmem_to_hbm [thread:$0]  %s124_s1, 128, %s126_s23, [#allocation4]  }
  0xb0   :  { %217 = dma.done.wait [#allocation4], 128  }
  0xb1   :  { %218 = vsyncadd [#allocation4], 4294967168 }
  0xb2   :  { %133 = vsyncpa [#allocation3], 1 }
  0xb3   :  { %134 = vsyncpa [#allocation6], 1 }
  0xb4   :  { %135 = vsyncpa [#allocation4], 1 }

</bundles_post_ra>
